<compile_context>
chip_gen: v6e
topology: v6e:2x2x1
jax: 0.10.0
libtpu: 0.0.40
codegen_flags: <defaults>
</compile_context>

<pallas_src>
import functools

import jax
import jax.numpy as jnp
from jax import lax
from jax.experimental import pallas as pl
from jax.experimental.pallas import tpu as pltpu


def _sampled_xe_kernel(row_ref, diag_ref, out_ref, *, tm, batch):
    i = pl.program_id(0)

    # (TM, C) tile; upcast to f32 for exp/log (bf16 inputs stay bf16 on the wire).
    x = row_ref[...].astype(jnp.float32)

    # Numerically stable row-wise logsumexp.
    m = jnp.max(x, axis=-1, keepdims=True)                                  # (TM, 1)
    lse = m + jnp.log(jnp.sum(jnp.exp(x - m), axis=-1, keepdims=True))      # (TM, 1)

    # Diagonal from the (TM, TM) sub-block whose columns start at i*TM, so the
    # global diagonal element of local row lr sits at local (lr, lr).
    d = diag_ref[...].astype(jnp.float32)                                   # (TM, TM)
    row_iota = lax.broadcasted_iota(jnp.int32, (tm, 1), 0)                  # (TM, 1)
    col_iota = lax.broadcasted_iota(jnp.int32, (1, tm), 1)                  # (1, TM)
    diag = jnp.sum(jnp.where(col_iota == row_iota, d, 0.0),
                   axis=-1, keepdims=True)                                  # (TM, 1)

    # Mask rows past the true batch size (partial last tile).  Keep the select
    # (not a multiply) so NaN/Inf from padded garbage rows cannot propagate.
    valid = (row_iota + i * tm) < batch
    partial = jnp.sum(jnp.where(valid, lse - diag, jnp.float32(0.0)))

    # One vreg per tile, broadcast the partial (full, unmasked store).
    out_ref[...] = jnp.full(out_ref.shape, partial, jnp.float32)


def _choose_row_tile(b, c, itemsize):
    """Largest row tile (multiple of 128, cap 1024) such that the
    double-buffered input blocks plus ~3 f32-sized intermediates fit a
    ~44 MiB VMEM budget (safe on v7x's 64 MiB physical VMEM)."""
    if b <= 128:
        return b
    budget = 44 * 1024 * 1024
    # per-row bytes: 2x (tm, c) input buffers + 2x (tm, tm<=1024) diag buffers
    # + ~3x f32 (tm, c) temporaries (astype(f32), x - m, exp).
    per_row = c * (2 * itemsize + 12) + 2 * itemsize * 1024
    tm = budget // max(1, per_row)
    tm = min(tm, 1024)
    tm = max(128, (tm // 128) * 128)
    # TODO(synk): for very large C (>= ~32K classes) switch to a chunked/online
    # logsumexp over column chunks so TM is not forced down by the f32 temps.
    return b if tm >= b else tm


def sampled_cross_entropy_loss(logit, row_tile=None):
    """logit: (B, B) float array -> scalar f32 loss (mean XE, target=arange(B))."""
    b, c = logit.shape
    assert b == c, "sampled XE requires n_classes == batch_size"

    itemsize = jnp.dtype(logit.dtype).itemsize
    tm = row_tile if row_tile is not None else _choose_row_tile(b, c, itemsize)
    tm = min(tm, b)
    num_tiles = pl.cdiv(b, tm)

    # VMEM accounting: double-buffered row + diag input blocks plus ~3 f32
    # temporaries of the row tile, clamped to 48 MiB (generation-safe cap).
    block_bytes = tm * c * itemsize
    diag_bytes = tm * tm * itemsize
    need = 2 * block_bytes + 2 * diag_bytes + 3 * tm * c * 4 + (2 << 20)
    vmem_limit = int(max(16 << 20, min(need, 48 << 20)))

    kernel = functools.partial(_sampled_xe_kernel, tm=tm, batch=b)
    partials = pl.pallas_call(
        kernel,
        out_shape=jax.ShapeDtypeStruct((num_tiles, 8, 128), jnp.float32),
        grid_spec=pltpu.PrefetchScalarGridSpec(
            num_scalar_prefetch=0,
            grid=(num_tiles,),
            in_specs=[
                pl.BlockSpec((tm, c), lambda i: (i, 0)),     # full rows (logsumexp)
                pl.BlockSpec((tm, tm), lambda i: (i, i)),    # diagonal sub-block
            ],
            out_specs=pl.BlockSpec((1, 8, 128), lambda i: (i, 0, 0)),
        ),
        compiler_params=pltpu.CompilerParams(
            # No grid-carried state -> row tiles are independent; on v7x the
            # two TensorCores split this axis.
            dimension_semantics=("parallel",),
            vmem_limit_bytes=vmem_limit,
        ),
    )(logit, logit)

    return jnp.sum(partials[:, 0, 0]) * jnp.float32(1.0 / b)


def _reference(logit):
    # Pure-JAX mirror of torch.nn.CrossEntropyLoss(logit + 1e-24, arange(B)).
    # (+1e-24 is a numerical no-op in f32 and cancels exactly in lse - diag.)
    x = logit.astype(jnp.float32)
    lse = jax.scipy.special.logsumexp(x, axis=-1)
    diag = jnp.diagonal(x)
    return jnp.mean(lse - diag)


if __name__ == "__main__":
    key = jax.random.PRNGKey(0)
    k1, k2, k3 = jax.random.split(key, 3)

    # Test 1: f32, evenly tiled (2 row tiles -> exercises per-tile partials
    # and the diagonal sub-block indexing).
    b1 = 256
    logit1 = jax.random.normal(k1, (b1, b1), dtype=jnp.float32)
    loss1 = jax.block_until_ready(sampled_cross_entropy_loss(logit1, row_tile=128))
    ref1 = jax.block_until_ready(_reference(logit1))
    assert jnp.allclose(loss1, ref1, atol=1e-5, rtol=1e-5), (loss1, ref1)

    # Test 2: bf16 input, B not a multiple of the row tile -> exercises the
    # partial last tile (row masking + partial diag sub-block).
    b2 = 200
    logit2 = jax.random.normal(k2, (b2, b2), dtype=jnp.float32).astype(jnp.bfloat16)
    loss2 = jax.block_until_ready(sampled_cross_entropy_loss(logit2, row_tile=128))
    ref2 = jax.block_until_ready(_reference(logit2))
    assert jnp.allclose(loss2, ref2, atol=1e-3, rtol=1e-3), (loss2, ref2)

    # Test 3: small batch, default (single full-block) tiling path.
    b3 = 96
    logit3 = jax.random.normal(k3, (b3, b3), dtype=jnp.float32)
    loss3 = jax.block_until_ready(sampled_cross_entropy_loss(logit3))
    ref3 = jax.block_until_ready(_reference(logit3))
    assert jnp.allclose(loss3, ref3, atol=1e-5, rtol=1e-5), (loss3, ref3)

    print("KERNEL_OK")
</pallas_src>

<mosaic_0001>
module attributes {stable_mosaic.version = 11 : i64} {
  func.func @_sampled_xe_kernel(%arg0: i32, %arg1: memref<128x256xf32, #tpu.memory_space<vmem>>, %arg2: memref<128x128xf32, #tpu.memory_space<vmem>>, %arg3: memref<1x8x128xf32, #tpu.memory_space<vmem>>) attributes {dimension_semantics = [#tpu.dimension_semantics<parallel>], iteration_bounds = array<i64: 2>, scalar_prefetch = 0 : i64, scratch_operands = 0 : i64, tpu.core_type = #tpu.core_type<tc>, window_params = [{transform_indices = @transform_0, window_bounds = array<i64: 128, 256>}, {transform_indices = @transform_1, window_bounds = array<i64: 128, 128>}, {transform_indices = @transform_2, window_bounds = array<i64: 1, 8, 128>}]} {
    %c0 = arith.constant 0 : index
    %c0_0 = arith.constant 0 : index
    %0 = vector.load %arg1[%c0, %c0_0] : memref<128x256xf32, #tpu.memory_space<vmem>>, vector<128x256xf32>
    %cst = arith.constant dense<0xFF800000> : vector<128xf32>
    %1 = vector.multi_reduction <maximumf>, %0, %cst [1] : vector<128x256xf32> to vector<128xf32>
    %2 = vector.shape_cast %1 : vector<128xf32> to vector<128x1xf32>
    %3 = vector.broadcast %2 : vector<128x1xf32> to vector<128x256xf32>
    %4 = arith.subf %0, %3 : vector<128x256xf32>
    %5 = math.exp %4 : vector<128x256xf32>
    %cst_1 = arith.constant dense<0.000000e+00> : vector<128xf32>
    %6 = vector.multi_reduction <add>, %5, %cst_1 [1] : vector<128x256xf32> to vector<128xf32>
    %7 = vector.shape_cast %6 : vector<128xf32> to vector<128x1xf32>
    %8 = math.log %7 : vector<128x1xf32>
    %9 = arith.addf %2, %8 : vector<128x1xf32>
    %c0_2 = arith.constant 0 : index
    %c0_3 = arith.constant 0 : index
    %10 = vector.load %arg2[%c0_2, %c0_3] : memref<128x128xf32, #tpu.memory_space<vmem>>, vector<128x128xf32>
    %11 = tpu.iota {dimensions = array<i32: 0>} : vector<128x1xi32>
    %12 = tpu.iota {dimensions = array<i32: 1>} : vector<1x128xi32>
    %13 = vector.broadcast %12 : vector<1x128xi32> to vector<128x128xi32>
    %14 = vector.broadcast %11 : vector<128x1xi32> to vector<128x128xi32>
    %15 = arith.cmpi eq, %13, %14 : vector<128x128xi32>
    %cst_4 = arith.constant 0.000000e+00 : f32
    %16 = vector.broadcast %cst_4 : f32 to vector<128x128xf32>
    %17 = arith.select %15, %10, %16 : vector<128x128xi1>, vector<128x128xf32>
    %cst_5 = arith.constant dense<0.000000e+00> : vector<128xf32>
    %18 = vector.multi_reduction <add>, %17, %cst_5 [1] : vector<128x128xf32> to vector<128xf32>
    %19 = vector.shape_cast %18 : vector<128xf32> to vector<128x1xf32>
    %c128_i32 = arith.constant 128 : i32
    %20 = arith.muli %arg0, %c128_i32 : i32
    %21 = vector.broadcast %20 : i32 to vector<128x1xi32>
    %22 = arith.addi %11, %21 : vector<128x1xi32>
    %c256_i32 = arith.constant 256 : i32
    %23 = vector.broadcast %c256_i32 : i32 to vector<128x1xi32>
    %24 = arith.cmpi slt, %22, %23 : vector<128x1xi32>
    %25 = arith.subf %9, %19 : vector<128x1xf32>
    %cst_6 = arith.constant 0.000000e+00 : f32
    %26 = vector.broadcast %cst_6 : f32 to vector<128x1xf32>
    %27 = arith.select %24, %25, %26 : vector<128x1xi1>, vector<128x1xf32>
    %28 = vector.shape_cast %27 : vector<128x1xf32> to vector<1x128x1xf32>
    %cst_7 = arith.constant dense<0.000000e+00> : vector<1xf32>
    %29 = vector.multi_reduction <add>, %28, %cst_7 [1, 2] : vector<1x128x1xf32> to vector<1xf32>
    %30 = vector.shape_cast %29 : vector<1xf32> to vector<1x1x1xf32>
    %31 = vector.extract %30[0, 0, 0] : f32 from vector<1x1x1xf32>
    %32 = vector.broadcast %31 : f32 to vector<1x8x128xf32>
    %c0_8 = arith.constant 0 : index
    %c0_9 = arith.constant 0 : index
    %c0_10 = arith.constant 0 : index
    %33 = vector.load %arg3[%c0_8, %c0_9, %c0_10] : memref<1x8x128xf32, #tpu.memory_space<vmem>>, vector<1x8x128xf32>
    tpu.vector_store %arg3[%c0_8, %c0_9, %c0_10], %32 {strides = array<i32>} : memref<1x8x128xf32, #tpu.memory_space<vmem>>, vector<1x8x128xf32>,
    return
  }
  func.func @transform_0(%arg0: i32) -> (i32, i32) {
    %c0_i32 = arith.constant 0 : i32
    %c0_i32_0 = arith.constant 0 : i32
    return %arg0, %c0_i32 : i32, i32
  }
  func.func @transform_1(%arg0: i32) -> (i32, i32) {
    %c0_i32 = arith.constant 0 : i32
    return %arg0, %arg0 : i32, i32
  }
  func.func @transform_2(%arg0: i32) -> (i32, i32, i32) {
    %c0_i32 = arith.constant 0 : i32
    %c0_i32_0 = arith.constant 0 : i32
    %c0_i32_1 = arith.constant 0 : i32
    return %arg0, %c0_i32, %c0_i32_0 : i32, i32, i32
  }
}

</mosaic_0001>

<bundles_post_ra>
// kernel: tpu_custom_call.1
= control target key start
LH: loop header
LB: loop body
LE: loop exit
PB: predicated region body
PF: predicated region fallthrough
CT: control target
= control target key end

     0   :  { %7 = vsyncpa [#allocation3], 0  ;;  %s1821_s0 = inlined_call_operand.hbm [shape: f32[256,256], index: 0, kind: input, shape index: {}]   ;;  %s1822_s1 = inlined_call_operand.hbm [shape: f32[256,256], index: 1, kind: input, shape index: {}]   ;;  %s1823_s2 = inlined_call_operand.hbm [shape: f32[2,8,128], index: 2, kind: output, shape index: {}]  }
   0x1   :  { %9 = vsyncpa [#allocation3 + $0x1], 0 }
   0x2   :  { %10 = vsyncpa [#allocation6], 0 }
   0x3   :  { %12 = vsyncpa [#allocation6 + $0x1], 0 }
   0x4   :  { %13 = vsyncpa [#allocation4], 0 }
   0x5   :  { %15 = vsyncpa [#allocation4 + $0x1], 0  ;;  %s1170_s9 = smov 0   ;;  %s1172_s10 = smov 0  }
   0x6   :  { %s1174_s11 = smov 0   ;;  %s1176_s12 = smov 0  }
   0x7   :  { %s1178_s13 = smov 0   ;;  %s1180_s14 = smov 0  }
   0x8   :  { %s1182_s15 = smov 0  }
   0x9 LB: > { %s1206_s16 = sadd.s32 4294967295, %s1146_s15   ;;  %s798_s17 = sadd.s32 4294967294, %s1146_s15   ;;  %s1146_s15 = sphi %s1182_s15, %s1857_s15   ;;  %s1142_s14 = sphi %s1180_s14, %s1856_s14   ;;  %s1138_s13 = sphi %s1178_s13, %s1855_s13   ;;  %s1134_s12 = sphi %s1176_s12, %s1854_s12   ;;  %s1130_s11 = sphi %s1174_s11, %s1853_s11   ;;  %s1126_s10 = sphi %s1172_s10, %s1852_s10   ;;  %s1122_s9 = sphi %s1170_s9, %s1851_s9  }
   0xa   : > { %s1210_s18 = sadd.s32 1, %s1146_s15   ;;  %s28_s19 = sadd.s32 1, %s1142_s14 }
   0xb   : > { %s25_s20 = ssub.s32 %s1146_s15, %s1210_s18  ;;  %p35_p0 = scmp.ne.s32.totalorder %s1142_s14, %s1138_s13 }
   0xc   : > { %p26_p1 = scmp.eq.s32.totalorder %s25_s20, 0  ;;  %p1826_p2 = scmp.eq.s32.totalorder %s1146_s15, 0 }
   0xd   : > { %p41_p3 = scmp.ne.s32.totalorder %s1138_s13, %s1134_s12  ;;  %p1825_p4 = scmp.eq.s32.totalorder %s1206_s16, 0 }
   0xe   : > { %s1222_s21 = scalar_select %p26_p1, %s1142_s14, %s28_s19  }
   0xf   : > { %p1226_p5 = por %p1826_p2, %p35_p0  ;;  %p1232_p6 = por %p1825_p4, %p41_p3 }
  0x10   : > { %s53_s24 = sor.u32 %s25_s20, %s25_s20  ;;  %p93_p7 = scmp.eq.s32.totalorder %s1206_s16, 1 }
  0x11   : > { %s1832_s23 = scalar_select %p1232_p6, 1, 0 }
  0x12   : > { %p1237_p8 = scmp.eq.s32.totalorder %s53_s24, 0  ;;  %p99_p9 = scmp.eq.s32.totalorder %s798_s17, 1 }
  0x13   : > { %p1241_p10 = por %p93_p7, %p35_p0  ;;  %p1824_p13 = scmp.lt.s32.totalorder %s1146_s15, 2 }
  0x14   : > { %s1833_s25 = scalar_select %p1237_p8, 1, 0 }
  0x15   : > { %s1834_s26 = scalar_select %p1241_p10, 1, 0 }
  0x16   : > { %p1246_p12 = por %p99_p9, %p41_p3  ;;  %s119_s28 = sand.u32 1, %s1142_s14  }
  0x17   : > { %s819_s29 = sshll.u32 %s1146_s15, 12  ;;  %s801_s30 = sshll.u32 %s119_s28, 8 }
  0x18   : > { %s1835_s27 = scalar_select %p1246_p12, 1, 0 }
  0x19   : > { %s1256_s5 = scalar_lea.hbm %s1821_s0, %s819_s29  ;;  %s123_s6 = scalar_lea.vmem [#allocation2], %s801_s30 }
  0x1a   : > { %s131_s7 = sshll.u32 %s123_s6, 4  ;;  %p1262_p0 = pnand %p1824_p13, %p1226_p5  ;;  %s1266_s7 = int_to_ptr.vmem [resolvable:$true] %s131_s7 }
  0x1b   : > { %s1268_s17 = scalar_lea.sflag [#allocation3], %s119_s28  ;;  %s998_s19 = scalar_lea.hbm %s1256_s5, 4096 }
  0x1c   : > { %p999_p1 = scmp.ne.s32.totalorder %s1256_s5, %s998_s19  ;;  %p1000_p3 = pneg %p1262_p0 }
  0x1d   : > { %s1003_s22 = scalar_lea.hbm %s1821_s0, 8192  ;;  %p1004_p5 = scmp.lt.s32.totalorder %s1256_s5, %s1821_s0 }
  0x1e   : > { %p1001_p7 = pnand %p1000_p3, %p999_p1  ;;  %p1005_p11 = scmp.lt.s32.totalorder %s1003_s22, %s998_s19 }
  0x20   : > { %p1002_p9 = pneg %p1001_p7  ;;  %p1006_p13 = por %p1005_p11, %p1004_p5 }
  0x22   : > { %p1007_p4 = pnand %p1006_p13, %p1002_p9 }
  0x24   : > { %1010 = shalt.err (!%p1007_p4)
}
  0x25   : > { %s1011_s28 = scalar_lea.vmem %s1266_s7, 4096  ;;  %s1148_s3 = smov [#allocation2]  }
  0x26   : > { %p1012_p2 = scmp.ne.s32.totalorder %s1266_s7, %s1011_s28  ;;  %s1016_s4 = sshll.u32 %s1148_s3, 4  ;;  %s1017_s4 = int_to_ptr.vmem [resolvable:$false] %s1016_s4 }
  0x27   : > { %s1018_s6 = scalar_lea.vmem %s1017_s4, 8192  ;;  %p1019_p7 = scmp.lt.s32.totalorder %s1266_s7, %s1017_s4 }
  0x28   : > { %p1014_p12 = pnand %p1012_p2, %p1000_p3  ;;  %p1020_p10 = scmp.lt.s32.totalorder %s1018_s6, %s1011_s28 }
  0x2a   : > { %p1015_p1 = pneg %p1014_p12  ;;  %p1021_p6 = por %p1020_p10, %p1019_p7 }
  0x2c   : > { %p1022_p8 = pnand %p1021_p6, %p1015_p1 }
  0x2e   : > { %1025 = shalt.err (!%p1022_p8)
}
  0x2f   : > { %s1829_s19 = smov 256   ;;  %s1150_s20 = smov 16  }
  0x30   : > { %832 = dma.hbm_to_vmem [thread:$0]  (!%p1262_p0), %s1256_s5, 4096, %s1266_s7, %s1268_s17, %s1829_s19, %s1829_s19, %s1150_s20  }
  0x31   : > { %p809_p2 = scmp.ge.s32.totalorder %s1146_s15, 1  ;;  %p162_p4 = scmp.lt.s32.totalorder %s1146_s15, 3 }
  0x32   : > { %s56_s22 = sadd.s32 1, %s1130_s11  ;;  %p1838_p8 = scmp.ne.s32.totalorder %s1833_s25, 0 }
  0x33   : > { %p1293_p6 = pnand %p809_p2, %p162_p4  ;;  %p63_p10 = scmp.ne.s32.totalorder %s1130_s11, %s1126_s10 }
  0x34   : > { %s1301_s29 = scalar_select %p1838_p8, %s1130_s11, %s56_s22  }
  0x35   : > { %s1837_s24 = scalar_select %p1293_p6, 1, 0 }
  0x36   : > { %p69_p11 = scmp.ne.s32.totalorder %s1126_s10, %s1122_s9  ;;  %s141_s30 = sand.u32 1, %s1130_s11  }
  0x37   : > { %s820_s28 = sshll.u32 %s1146_s15, 5  ;;  %p1839_p12 = scmp.eq.s32.totalorder %s1146_s15, 0 }
  0x38   : > { %p1840_p3 = scmp.eq.s32.totalorder %s1206_s16, 0  ;;  %s805_s7 = sshll.u32 %s141_s30, 7 }
  0x39   : > { %p65_p13 = por %p63_p10, %p1839_p12  ;;  %s151_s8 = sadd.s32 %s1146_s15, %s820_s28 }
  0x3a   : > { %p1313_p9 = por %p69_p11, %p1840_p3  ;;  %s808_s17 = sshll.u32 %s151_s8, 7 }
  0x3b   : > { %s145_s3 = scalar_lea.vmem [#allocation5], %s805_s7  ;;  %s1321_s20 = scalar_lea.hbm %s1822_s1, %s808_s17 }
  0x3c   : > { %s1841_s5 = scalar_select %p1313_p9, 1, 0 }
  0x3d   : > { %s154_s4 = sshll.u32 %s145_s3, 4  ;;  %p1842_p0 = scmp.lt.s32.totalorder %s1146_s15, 2  ;;  %s1323_s4 = int_to_ptr.vmem [resolvable:$true] %s154_s4 }
  0x3e   : > { %s1331_s22 = scalar_lea.sflag [#allocation6], %s141_s30  ;;  %s1026_s28 = scalar_lea.hbm %s1321_s20, 2048 }
  0x3f   : > { %p1327_p5 = pnand %p1842_p0, %p65_p13  ;;  %p1027_p1 = scmp.ne.s32.totalorder %s1321_s20, %s1026_s28 }
  0x40   : > { %s1031_s17 = scalar_lea.hbm %s1822_s1, 8192  ;;  %p1032_p8 = scmp.lt.s32.totalorder %s1321_s20, %s1822_s1 }
  0x41   : > { %p1028_p7 = pneg %p1327_p5  ;;  %p1033_p10 = scmp.lt.s32.totalorder %s1031_s17, %s1026_s28 }
  0x43   : > { %p1029_p2 = pnand %p1028_p7, %p1027_p1  ;;  %p1034_p11 = por %p1033_p10, %p1032_p8 }
  0x45   : > { %p1030_p4 = pneg %p1029_p2 }
  0x47   : > { %p1035_p12 = pnand %p1034_p11, %p1030_p4 }
  0x49   : > { %1038 = shalt.err (!%p1035_p12)
}
  0x4a   : > { %s1039_s30 = scalar_lea.vmem %s1323_s4, 2048  ;;  %s1151_s25 = smov [#allocation5]  }
  0x4b   : > { %p1040_p13 = scmp.ne.s32.totalorder %s1323_s4, %s1039_s30  ;;  %s1044_s19 = sshll.u32 %s1151_s25, 4  ;;  %s1045_s19 = int_to_ptr.vmem [resolvable:$false] %s1044_s19 }
  0x4c   : > { %s1046_s7 = scalar_lea.vmem %s1045_s19, 4096  ;;  %p1047_p1 = scmp.lt.s32.totalorder %s1323_s4, %s1045_s19 }
  0x4d   : > { %p1042_p3 = pnand %p1040_p13, %p1028_p7  ;;  %p1048_p2 = scmp.lt.s32.totalorder %s1046_s7, %s1039_s30 }
  0x4f   : > { %p1043_p0 = pneg %p1042_p3  ;;  %p1049_p9 = por %p1048_p2, %p1047_p1 }
  0x51   : > { %p1050_p6 = pnand %p1049_p9, %p1043_p0 }
  0x53   : > { %1053 = shalt.err (!%p1050_p6)
}
  0x54   : > { %s1152_s28 = smov 128   ;;  %s1153_s8 = smov 8  }
  0x55   : > { %s1844_s17 = smov 256   ;;  %p1845_p7 = scmp.ne.s32.totalorder %s1837_s24, 0 }
  0x56   : > { %835 = dma.hbm_to_vmem [thread:$0]  (!%p1327_p5), %s1321_s20, 2048, %s1323_s4, %s1331_s22, %s1844_s17, %s1152_s28, %s1153_s8  }
  0x57   : > { %166 = sbr.rel (%p1845_p7) target bundleno = 677 (0x2a5), region = 28  ;;  %s1356_s3 = sand.u32 (!%p1845_p7), 1, %s1138_s13  }
  0x58   : > { %s810_s19 = sshll.u32 (!%p1845_p7), %s1356_s3, 8  ;;  %s169_s6 = scalar_lea.sflag (!%p1845_p7), [#allocation3], %s1356_s3 }
  0x59   : > { %s1360_s30 = scalar_lea.vmem (!%p1845_p7), [#allocation2], %s810_s19  ;;  %p1846_p6 = scmp.ne.s32.totalorder (!%p1845_p7), %s1832_s23, 0 }
  0x5c   : > { %1109 = dma.done.wait (%p1846_p6), %s169_s6, 4096  }
  0x5d   : > { %1111 = vsyncadd (%p1846_p6), %s169_s6, 4294963200  ;;  %s177_s4 = sand.u32 1, %s1126_s10   ;;  %p1847_p9 = scmp.ne.s32.totalorder %s1841_s5, 0 }
  0x5e   : > { %s811_s24 = sshll.u32 %s177_s4, 7  ;;  %s178_s20 = scalar_lea.sflag [#allocation6], %s177_s4 }
  0x5f   : > { %s1367_s9 = scalar_lea.vmem [#allocation5], %s811_s24 }
  0x60   : > { %1113 = dma.done.wait (%p1847_p9), %s178_s20, 2048  }
  0x61   : > { %1115 = vsyncadd (%p1847_p9), %s178_s20, 4294965248  ;;  %v1374_v0 = vld [vmem:[%s1360_s30] sm:$0xff]  ;;  %v1377_v1 = vld [vmem:[%s1360_s30 + $0x8] sm:$0xff]  ;;  %v497_v34 = vlaneseq  ;;  %s813_s23 = sshll.u32 %s1206_s16, 7  ;;  %s812_s5 = sshll.u32 %s1356_s3, 3 }
  0x62   : > { %v1380_v2 = vld [vmem:[%s1360_s30 + $0x20] sm:$0xff]  ;;  %v241_v3 = vmax.f32 %v1374_v0, %v1377_v1  ;;  %v1385_v4 = vld [vmem:[%s1360_s30 + $0x28] sm:$0xff]  ;;  %v1388_v5 = vld [vmem:[%s1360_s30 + $0x10] sm:$0xff]  ;;  %s206_s22 = scalar_lea.vmem [#allocation7], %s812_s5  ;;  %s701_s17 = scalar_lea.hbm %s1823_s2, %s813_s23 }
  0x63   : > { %v1391_v6 = vld [vmem:[%s1360_s30 + $0x18] sm:$0xff]  ;;  %v247_v7 = vmax.f32 %v1380_v2, %v1385_v4  ;;  %v1396_v8 = vld [vmem:[%s1360_s30 + $0x30] sm:$0xff]  ;;  %v1406_v12 = vld [vmem:[%s1360_s30 + $0x40] sm:$0xff]  ;;  %v1481_v41 = vshrl.u32 %v497_v34, 7  ;;  %v1502_v49 = vand.u32 127, %v497_v34  ;;  %s703_s25 = sshll.u32 %s206_s22, 4  ;;  %s1770_s25 = int_to_ptr.vmem [resolvable:$true] %s703_s25 }
  0x64   : > { %v1399_v9 = vld [vmem:[%s1360_s30 + $0x38] sm:$0xff]  ;;  %242 = vmax.xlane.f32.xlu0 %v241_v3  ;;  %v244_v10 = vmax.f32 %v1388_v5, %v1391_v6  ;;  %v1409_v13 = vld [vmem:[%s1360_s30 + $0x48] sm:$0xff]  ;;  %v1412_v14 = vld [vmem:[%s1360_s30 + $0x50] sm:$0xff]  ;;  %s690_s19 = scalar_lea.sflag [#allocation4], %s1356_s3  ;;  %s1054_s6 = scalar_lea.vmem %s1770_s25, 128 }
  0x65   : > { %248 = vmax.xlane.f32.xlu1 %v247_v7  ;;  %v250_v11 = vmax.f32 %v1396_v8, %v1399_v9  ;;  %v1415_v15 = vld [vmem:[%s1360_s30 + $0x58] sm:$0xff]  ;;  %v253_v16 = vmax.f32 %v1406_v12, %v1409_v13  ;;  %v1422_v18 = vld [vmem:[%s1360_s30 + $0x60] sm:$0xff]  ;;  %v1425_v19 = vld [vmem:[%s1360_s30 + $0x68] sm:$0xff]  ;;  %v1500_v48 = vadd.s32 8, %v1481_v41  ;;  %v1512_v53 = vadd.s32 16, %v1481_v41  ;;  %p1055_p5 = scmp.ne.s32.totalorder %s1770_s25, %s1054_s6  ;;  %p1848_p4 = scmp.ne.s32.totalorder %s1834_s26, 0 }
  0x66   : > { %v256_v17 = vmax.f32 %v1412_v14, %v1415_v15  ;;  %v1428_v20 = vld [vmem:[%s1360_s30 + $0x70] sm:$0xff]  ;;  %v1431_v21 = vld [vmem:[%s1360_s30 + $0x78] sm:$0xff]  ;;  %v259_v22 = vmax.f32 %v1422_v18, %v1425_v19  ;;  %v1438_v24 = vld [vmem:[%s1360_s30 + $0x80] sm:$0xff]  ;;  %vm516_vm1 = vcmp.eq.s32.totalorder %v1502_v49, %v1481_v41  ;;  %v1521_v57 = vadd.s32 24, %v1481_v41 }
  0x67   : > { %v262_v23 = vmax.f32 %v1428_v20, %v1431_v21  ;;  %v1441_v25 = vld [vmem:[%s1360_s30 + $0x88] sm:$0xff]  ;;  %v1444_v26 = vld [vmem:[%s1360_s30 + $0x90] sm:$0xff]  ;;  %v1447_v27 = vld [vmem:[%s1360_s30 + $0x98] sm:$0xff]  ;;  %vm517_vm0 = vcmp.eq.s32.totalorder %v1502_v49, %v1500_v48  ;;  %vm518_vm2 = vcmp.eq.s32.totalorder %v1502_v49, %v1512_v53  ;;  %p1056_p8 = pnand %p1055_p5, %p1848_p4 }
  0x68   : > { %245 = vmax.xlane.f32.xlu0 %v244_v10  ;;  %v265_v28 = vmax.f32 %v1438_v24, %v1441_v25  ;;  %v268_v29 = vmax.f32 %v1444_v26, %v1447_v27  ;;  %v1454_v30 = vld [vmem:[%s1360_s30 + $0xa0] sm:$0xff]  ;;  %v1457_v31 = vld [vmem:[%s1360_s30 + $0xa8] sm:$0xff]  ;;  %v1460_v32 = vld [vmem:[%s1360_s30 + $0xb0] sm:$0xff]  ;;  %vm519_vm3 = vcmp.eq.s32.totalorder %v1502_v49, %v1521_v57 }
  0x69   : > { %251 = vmax.xlane.f32.xlu1 %v250_v11  ;;  %v1463_v33 = vld [vmem:[%s1360_s30 + $0xb8] sm:$0xff]  ;;  %v271_v35 = vmax.f32 %v1454_v30, %v1457_v31  ;;  %v1470_v37 = vld [vmem:[%s1360_s30 + $0xc0] sm:$0xff]  ;;  %v1473_v38 = vld [vmem:[%s1360_s30 + $0xc8] sm:$0xff]  ;;  %p1057_p10 = pneg %p1056_p8 }
  0x6a   : > { %v274_v36 = vmax.f32 %v1460_v32, %v1463_v33  ;;  %v1476_v39 = vld [vmem:[%s1360_s30 + $0xd0] sm:$0xff]  ;;  %v1479_v40 = vld [vmem:[%s1360_s30 + $0xd8] sm:$0xff]  ;;  %v277_v42 = vmax.f32 %v1470_v37, %v1473_v38  ;;  %v1488_v44 = vld [vmem:[%s1360_s30 + $0xe0] sm:$0xff] }
  0x6b   : > { %v280_v43 = vmax.f32 %v1476_v39, %v1479_v40  ;;  %v1491_v45 = vld [vmem:[%s1360_s30 + $0xe8] sm:$0xff]  ;;  %v1494_v46 = vld [vmem:[%s1360_s30 + $0xf0] sm:$0xff]  ;;  %v1497_v47 = vld [vmem:[%s1360_s30 + $0xf8] sm:$0xff]  ;;  %s1154_s30 = smov [#allocation7]  }
  0x6c   : > { %254 = vmax.xlane.f32.xlu0 %v253_v16  ;;  %v283_v50 = vmax.f32 %v1488_v44, %v1491_v45  ;;  %v286_v51 = vmax.f32 %v1494_v46, %v1497_v47  ;;  %v482_v52 = vld [vmem:[%s1367_s9 + $0x8] sm:$0xff]  ;;  %v481_v55 = vld [vmem:[%s1367_s9] sm:$0xff]  ;;  %v483_v56 = vld [vmem:[%s1367_s9 + $0x10] sm:$0xff]  ;;  %s1058_s4 = sshll.u32 %s1154_s30, 4  ;;  %s1059_s4 = int_to_ptr.vmem [resolvable:$false] %s1058_s4 }
  0x6d   : > { %257 = vmax.xlane.f32.xlu1 %v256_v17  ;;  %v533_v54 = vsel %vm517_vm0, %v482_v52, 0.0  ;;  %v532_v58 = vsel %vm516_vm1, %v481_v55, 0.0  ;;  %v534_v59 = vsel %vm518_vm2, %v483_v56, 0.0  ;;  %v484_v60 = vld [vmem:[%s1367_s9 + $0x18] sm:$0xff]  ;;  %s1060_s24 = scalar_lea.vmem %s1059_s4, 256  ;;  %p1061_p11 = scmp.lt.s32.totalorder %s1770_s25, %s1059_s4 }
  0x6e   : > { %v535_v61 = vsel %vm519_vm3, %v484_v60, 0.0  ;;  %vm646_vm3 = vcmask 7168   ;;  %p1062_p12 = scmp.lt.s32.totalorder %s1060_s24, %s1054_s6 }
  0x70   : > { %260 = vmax.xlane.f32.xlu0 %v259_v22  ;;  %p1063_p13 = por %p1062_p12, %p1061_p11 }
  0x71   : > { %263 = vmax.xlane.f32.xlu1 %v262_v23 }
  0x72   : > { %p1064_p3 = pnand %p1063_p13, %p1057_p10 }
  0x74   : > { %266 = vmax.xlane.f32.xlu0 %v265_v28 }
  0x75   : > { %269 = vmax.xlane.f32.xlu1 %v268_v29 }
  0x78   : > { %272 = vmax.xlane.f32.xlu0 %v271_v35 }
  0x79   : > { %275 = vmax.xlane.f32.xlu1 %v274_v36 }
  0x7c   : > { %278 = vmax.xlane.f32.xlu0 %v277_v42 }
  0x7d   : > { %281 = vmax.xlane.f32.xlu1 %v280_v43 }
  0x80   : > { %284 = vmax.xlane.f32.xlu0 %v283_v50 }
  0x81   : > { %287 = vmax.xlane.f32.xlu1 %v286_v51 }
  0x84   : > { %550 = vadd.xlane.f32.xlu0 %v533_v54 }
  0x85   : > { %548 = vadd.xlane.f32.xlu1 %v532_v58 }
  0x88   : > { %552 = vadd.xlane.f32.xlu0 %v534_v59 }
  0x8c   : > { %554 = vadd.xlane.f32.xlu0 %v535_v61 }
  0xed   : > { %v1526_v62 = vpop.xlane.xlu0 %242 }
  0xee   : > { %v289_v63 = vsub.f32 %v1374_v0, %v1526_v62  ;;  %v290_v3 = vsub.f32 %v1377_v1, %v1526_v62  ;;  %v1532_v7 = vpop.xlane.xlu1 %248 }
  0xef   : > { %v293_v10 = vsub.f32 %v1380_v2, %v1532_v7  ;;  %v294_v11 = vsub.f32 %v1385_v4, %v1532_v7 }
  0xf0   : > { %v321_v16 = vmul.f32 1.442695, %v289_v63  ;;  %v323_v17 = vmul.f32 1.442695, %v290_v3 }
  0xf1   : > { %v329_v22 = vmul.f32 1.442695, %v293_v10  ;;  %v331_v23 = vmul.f32 1.442695, %v294_v11  ;;  %v1538_v28 = vpop.xlane.xlu0 %245 }
  0xf2   : > { %902 = vpow2.f32 %v321_v16  ;;  %v291_v0 = vsub.f32 %v1388_v5, %v1538_v28  ;;  %v292_v1 = vsub.f32 %v1391_v6, %v1538_v28  ;;  %v1544_v29 = vpop.xlane.xlu1 %251 }
  0xf3   : > { %904 = vpow2.f32 %v323_v17  ;;  %v295_v2 = vsub.f32 %v1396_v8, %v1544_v29  ;;  %v296_v4 = vsub.f32 %v1399_v9, %v1544_v29 }
  0xf4   : > { %906 = vpow2.f32 %v329_v22  ;;  %v325_v34 = vmul.f32 1.442695, %v291_v0  ;;  %v327_v35 = vmul.f32 1.442695, %v292_v1 }
  0xf5   : > { %908 = vpow2.f32 %v331_v23  ;;  %v333_v36 = vmul.f32 1.442695, %v295_v2  ;;  %v335_v42 = vmul.f32 1.442695, %v296_v4  ;;  %v1550_v43 = vpop.xlane.xlu0 %254 }
  0xf6   : > { %910 = vpow2.f32 %v325_v34  ;;  %v297_v5 = vsub.f32 %v1406_v12, %v1550_v43  ;;  %v298_v6 = vsub.f32 %v1409_v13, %v1550_v43  ;;  %v1556_v50 = vpop.xlane.xlu1 %257 }
  0xf7   : > { %912 = vpow2.f32 %v327_v35  ;;  %v299_v8 = vsub.f32 %v1412_v14, %v1556_v50  ;;  %v300_v9 = vsub.f32 %v1415_v15, %v1556_v50 }
  0xf8   : > { %914 = vpow2.f32 %v333_v36  ;;  %v337_v51 = vmul.f32 1.442695, %v297_v5  ;;  %v339_v52 = vmul.f32 1.442695, %v298_v6 }
  0xf9   : > { %916 = vpow2.f32 %v335_v42  ;;  %v341_v54 = vmul.f32 1.442695, %v299_v8  ;;  %v343_v55 = vmul.f32 1.442695, %v300_v9  ;;  %v1562_v56 = vpop.xlane.xlu0 %260 }
  0xfa   : > { %918 = vpow2.f32 %v337_v51  ;;  %v301_v12 = vsub.f32 %v1422_v18, %v1562_v56  ;;  %v302_v13 = vsub.f32 %v1425_v19, %v1562_v56  ;;  %v1568_v58 = vpop.xlane.xlu1 %263 }
  0xfb   : > { %920 = vpow2.f32 %v339_v52  ;;  %v303_v14 = vsub.f32 %v1428_v20, %v1568_v58  ;;  %v304_v15 = vsub.f32 %v1431_v21, %v1568_v58 }
  0xfc   : > { %922 = vpow2.f32 %v341_v54  ;;  %v345_v59 = vmul.f32 1.442695, %v301_v12  ;;  %v347_v60 = vmul.f32 1.442695, %v302_v13 }
  0xfd   : > { %924 = vpow2.f32 %v343_v55  ;;  %v349_v61 = vmul.f32 1.442695, %v303_v14  ;;  %v351_v63 = vmul.f32 1.442695, %v304_v15  ;;  %v1574_v3 = vpop.xlane.xlu0 %266 }
  0xfe   : > { %926 = vpow2.f32 %v345_v59  ;;  %v305_v18 = vsub.f32 %v1438_v24, %v1574_v3  ;;  %v306_v19 = vsub.f32 %v1441_v25, %v1574_v3  ;;  %v1580_v10 = vpop.xlane.xlu1 %269 }
  0xff   : > { %v903_v20 = vpop.eup %902  ;;  %928 = vpow2.f32 %v347_v60  ;;  %v307_v21 = vsub.f32 %v1444_v26, %v1580_v10  ;;  %v308_v11 = vsub.f32 %v1447_v27, %v1580_v10 }
 0x100   : > { %v905_v16 = vpop.eup %904  ;;  %930 = vpow2.f32 %v349_v61  ;;  %v353_v17 = vmul.f32 1.442695, %v305_v18  ;;  %v355_v22 = vmul.f32 1.442695, %v306_v19 }
 0x101   : > { %v907_v23 = vpop.eup %906  ;;  %932 = vpow2.f32 %v351_v63  ;;  %v357_v24 = vmul.f32 1.442695, %v307_v21  ;;  %v359_v0 = vmul.f32 1.442695, %v308_v11  ;;  %v1586_v1 = vpop.xlane.xlu0 %272  ;;  %v385_v25 = vadd.f32 %v905_v16, %v903_v20 }
 0x102   : > { %v909_v2 = vpop.eup %908  ;;  %934 = vpow2.f32 %v353_v17  ;;  %v309_v4 = vsub.f32 %v1454_v30, %v1586_v1  ;;  %v310_v26 = vsub.f32 %v1457_v31, %v1586_v1  ;;  %v1592_v27 = vpop.xlane.xlu1 %275 }
 0x103   : > { %v911_v34 = vpop.eup %910  ;;  %936 = vpow2.f32 %v355_v22  ;;  %386 = vadd.xlane.f32.xlu0 %v385_v25  ;;  %v311_v35 = vsub.f32 %v1460_v32, %v1592_v27  ;;  %v312_v36 = vsub.f32 %v1463_v33, %v1592_v27  ;;  %v391_v42 = vadd.f32 %v909_v2, %v907_v23 }
 0x104   : > { %v913_v5 = vpop.eup %912  ;;  %938 = vpow2.f32 %v357_v24  ;;  %v361_v6 = vmul.f32 1.442695, %v309_v4  ;;  %v363_v8 = vmul.f32 1.442695, %v310_v26 }
 0x105   : > { %v915_v30 = vpop.eup %914  ;;  %940 = vpow2.f32 %v359_v0  ;;  %v365_v9 = vmul.f32 1.442695, %v311_v35  ;;  %v367_v31 = vmul.f32 1.442695, %v312_v36  ;;  %v388_v51 = vadd.f32 %v913_v5, %v911_v34  ;;  %v1598_v52 = vpop.xlane.xlu0 %278 }
 0x106   : > { %v917_v54 = vpop.eup %916  ;;  %942 = vpow2.f32 %v361_v6  ;;  %v313_v32 = vsub.f32 %v1470_v37, %v1598_v52  ;;  %v314_v33 = vsub.f32 %v1473_v38, %v1598_v52  ;;  %v1604_v55 = vpop.xlane.xlu1 %281  ;;  %v1623_v36 = vadd.s32 32, %v1481_v41 }
 0x107   : > { %v919_v12 = vpop.eup %918  ;;  %944 = vpow2.f32 %v363_v8  ;;  %392 = vadd.xlane.f32.xlu0 %v391_v42  ;;  %389 = vadd.xlane.f32.xlu1 %v388_v51  ;;  %v394_v13 = vadd.f32 %v917_v54, %v915_v30  ;;  %v315_v14 = vsub.f32 %v1476_v39, %v1604_v55  ;;  %v316_v15 = vsub.f32 %v1479_v40, %v1604_v55 }
 0x108   : > { %v921_v59 = vpop.eup %920  ;;  %946 = vpow2.f32 %v365_v9  ;;  %v369_v60 = vmul.f32 1.442695, %v313_v32  ;;  %v371_v37 = vmul.f32 1.442695, %v314_v33  ;;  %vm520_vm4 = vcmp.eq.s32.totalorder %v1502_v49, %v1623_v36 }
 0x109   : > { %v923_v61 = vpop.eup %922  ;;  %948 = vpow2.f32 %v367_v31  ;;  %v397_v38 = vadd.f32 %v921_v59, %v919_v12  ;;  %v1610_v63 = vpop.xlane.xlu0 %284  ;;  %v373_v19 = vmul.f32 1.442695, %v315_v14  ;;  %v375_v39 = vmul.f32 1.442695, %v316_v15  ;;  %v485_v31 = vld [vmem:[%s1367_s9 + $0x20] sm:$0xff]  ;;  %v486_v14 = vld [vmem:[%s1367_s9 + $0x28] sm:$0xff] }
 0x10a   : > { %v925_v18 = vpop.eup %924  ;;  %950 = vpow2.f32 %v369_v60  ;;  %v317_v20 = vsub.f32 %v1488_v44, %v1610_v63  ;;  %v318_v11 = vsub.f32 %v1491_v45, %v1610_v63  ;;  %v1616_v16 = vpop.xlane.xlu1 %287  ;;  %v1629_v51 = vadd.s32 40, %v1481_v41 }
 0x10b   : > { %v927_v21 = vpop.eup %926  ;;  %952 = vpow2.f32 %v371_v37  ;;  %395 = vadd.xlane.f32.xlu1 %v394_v13  ;;  %398 = vadd.xlane.f32.xlu0 %v397_v38  ;;  %v400_v40 = vadd.f32 %v925_v18, %v923_v61  ;;  %v319_v44 = vsub.f32 %v1494_v46, %v1616_v16  ;;  %v320_v45 = vsub.f32 %v1497_v47, %v1616_v16  ;;  %v487_v38 = vld [vmem:[%s1367_s9 + $0x30] sm:$0xff] }
 0x10c   : > { %v929_v17 = vpop.eup %928  ;;  %954 = vpow2.f32 %v373_v19  ;;  %v377_v0 = vmul.f32 1.442695, %v317_v20  ;;  %v379_v2 = vmul.f32 1.442695, %v318_v11  ;;  %v536_v13 = vsel %vm520_vm4, %v485_v31, 0.0 }
 0x10d   : > { %v931_v22 = vpop.eup %930  ;;  %v403_v23 = vadd.f32 %v929_v17, %v927_v21  ;;  %956 = vpow2.f32 %v375_v39  ;;  %v381_v5 = vmul.f32 1.442695, %v319_v44  ;;  %v383_v6 = vmul.f32 1.442695, %v320_v45  ;;  %v488_v45 = vld [vmem:[%s1367_s9 + $0x38] sm:$0xff] }
 0x10e   : > { %v933_v24 = vpop.eup %932  ;;  %958 = vpow2.f32 %v377_v0  ;;  %vm521_vm5 = vcmp.eq.s32.totalorder %v1502_v49, %v1629_v51  ;;  %v1635_v15 = vadd.s32 48, %v1481_v41  ;;  %v1641_v18 = vadd.s32 64, %v1481_v41  ;;  %v491_v0 = vld [vmem:[%s1367_s9 + $0x50] sm:$0xff] }
 0x10f   : > { %v935_v25 = vpop.eup %934  ;;  %401 = vadd.xlane.f32.xlu1 %v400_v40  ;;  %404 = vadd.xlane.f32.xlu0 %v403_v23  ;;  %v406_v4 = vadd.f32 %v933_v24, %v931_v22  ;;  %960 = vpow2.f32 %v379_v2  ;;  %v537_v61 = vsel %vm521_vm5, %v486_v14, 0.0  ;;  %v489_v40 = vld [vmem:[%s1367_s9 + $0x40] sm:$0xff]  ;;  %v1647_v11 = vadd.s32 80, %v1481_v41 }
 0x110   : > { %v937_v26 = vpop.eup %936  ;;  %962 = vpow2.f32 %v381_v5  ;;  %vm522_vm6 = vcmp.eq.s32.totalorder %v1502_v49, %v1635_v15  ;;  %vm524_vm7 = vcmp.eq.s32.totalorder %v1502_v49, %v1641_v18  ;;  %v1653_v44 = vadd.s32 56, %v1481_v41 }
 0x111   : > { %v939_v34 = vpop.eup %938  ;;  %v409_v35 = vadd.f32 %v937_v26, %v935_v25  ;;  %964 = vpow2.f32 %v383_v6  ;;  %v538_v39 = vsel %vm522_vm6, %v487_v38, 0.0  ;;  %v540_v24 = vsel %vm524_vm7, %v489_v40, 0.0  ;;  %v493_v26 = vld [vmem:[%s1367_s9 + $0x60] sm:$0xff] }
 0x112   : > { %v941_v42 = vpop.eup %940  ;;  %vm526_vm8 = vcmp.eq.s32.totalorder %v1502_v49, %v1647_v11  ;;  %v1656_v25 = vadd.s32 96, %v1481_v41  ;;  %vm523_vm9 = vcmp.eq.s32.totalorder %v1502_v49, %v1653_v44  ;;  %v1674_v6 = vadd.s32 88, %v1481_v41 }
 0x113   : > { %v943_v46 = vpop.eup %942  ;;  %407 = vadd.xlane.f32.xlu1 %v406_v4  ;;  %410 = vadd.xlane.f32.xlu0 %v409_v35  ;;  %v412_v8 = vadd.f32 %v941_v42, %v939_v34  ;;  %v542_v4 = vsel %vm526_vm8, %v491_v0, 0.0  ;;  %v1665_v34 = vadd.s32 72, %v1481_v41  ;;  %v1668_v35 = vadd.s32 112, %v1481_v41 }
 0x114   : > { %v945_v30 = vpop.eup %944  ;;  %vm528_vm10 = vcmp.eq.s32.totalorder %v1502_v49, %v1656_v25  ;;  %v539_v42 = vsel %vm523_vm9, %v488_v45, 0.0  ;;  %vm527_vm13 = vcmp.eq.s32.totalorder %v1502_v49, %v1674_v6  ;;  %v1683_v31 = vadd.s32 104, %v1481_v41 }
 0x115   : > { %v947_v9 = vpop.eup %946  ;;  %v415_v47 = vadd.f32 %v945_v30, %v943_v46  ;;  %v544_v5 = vsel %vm528_vm10, %v493_v26, 0.0  ;;  %v490_v46 = vld [vmem:[%s1367_s9 + $0x48] sm:$0xff]  ;;  %vm525_vm11 = vcmp.eq.s32.totalorder %v1502_v49, %v1665_v34  ;;  %vm530_vm12 = vcmp.eq.s32.totalorder %v1502_v49, %v1668_v35 }
 0x116   : > { %v949_v54 = vpop.eup %948  ;;  %v541_v30 = vsel %vm525_vm11, %v490_v46, 0.0  ;;  %vm529_vm14 = vcmp.eq.s32.totalorder %v1502_v49, %v1683_v31 }
 0x117   : > { %v951_v32 = vpop.eup %950  ;;  %413 = vadd.xlane.f32.xlu1 %v412_v8  ;;  %416 = vadd.xlane.f32.xlu0 %v415_v47  ;;  %v418_v33 = vadd.f32 %v949_v54, %v947_v9  ;;  %v495_v8 = vld [vmem:[%s1367_s9 + $0x70] sm:$0xff]  ;;  %v492_v47 = vld [vmem:[%s1367_s9 + $0x58] sm:$0xff] }
 0x118   : > { %v953_v12 = vpop.eup %952  ;;  %v546_v9 = vsel %vm530_vm12, %v495_v8, 0.0  ;;  %v543_v54 = vsel %vm527_vm13, %v492_v47, 0.0 }
 0x119   : > { %v955_v59 = vpop.eup %954  ;;  %v421_v60 = vadd.f32 %v953_v12, %v951_v32  ;;  %v494_v32 = vld [vmem:[%s1367_s9 + $0x68] sm:$0xff] }
 0x11a   : > { %v957_v37 = vpop.eup %956  ;;  %v545_v12 = vsel %vm529_vm14, %v494_v32, 0.0 }
 0x11b   : > { %419 = vadd.xlane.f32.xlu1 %v418_v33  ;;  %556 = vadd.xlane.f32.xlu0 %v536_v13  ;;  %v959_v19 = vpop.eup %958  ;;  %v424_v20 = vadd.f32 %v957_v37, %v955_v59  ;;  %v1689_v33 = vadd.s32 120, %v1481_v41  ;;  %v496_v13 = vld [vmem:[%s1367_s9 + $0x78] sm:$0xff]  ;;  %v551_v59 = vpop.xlane.xlu0 %550 }
 0x11c   : > { %v961_v21 = vpop.eup %960 }
 0x11d   : > { %v963_v17 = vpop.eup %962  ;;  %v427_v22 = vadd.f32 %v961_v21, %v959_v19  ;;  %vm531_vm15 = vcmp.eq.s32.totalorder %v1502_v49, %v1689_v33 }
 0x11e   : > { %v965_v23 = vpop.eup %964  ;;  %v547_v14 = vsel %vm531_vm15, %v496_v13, 0.0 }
 0x11f   : > { %558 = vadd.xlane.f32.xlu0 %v537_v61  ;;  %422 = vadd.xlane.f32.xlu1 %v421_v60  ;;  %v430_v2 = vadd.f32 %v965_v23, %v963_v17  ;;  %v553_v60 = vpop.xlane.xlu0 %552  ;;  %v549_v61 = vpop.xlane.xlu1 %548  ;;  %v1699_v17 = vstv %s813_s23 }
 0x120   : > { %v583_v26 = vadd.s32 %v1699_v17, %v1500_v48 }
 0x122   : > { %vm599_vm1 = vcmp.lt.s32.totalorder %v583_v26, 256 }
 0x123   : > { %560 = vadd.xlane.f32.xlu0 %v538_v39  ;;  %425 = vadd.xlane.f32.xlu1 %v424_v20  ;;  %v1694_v37 = vpop.xlane.xlu0 %554 }
 0x127   : > { %564 = vadd.xlane.f32.xlu0 %v540_v24  ;;  %428 = vadd.xlane.f32.xlu1 %v427_v22  ;;  %v582_v24 = vadd.s32 %v1699_v17, %v1481_v41 }
 0x129   : > { %vm598_vm0 = vcmp.lt.s32.totalorder %v582_v24, 256 }
 0x12b   : > { %568 = vadd.xlane.f32.xlu0 %v542_v4  ;;  %431 = vadd.xlane.f32.xlu1 %v430_v2 }
 0x12f   : > { %562 = vadd.xlane.f32.xlu1 %v539_v42  ;;  %572 = vadd.xlane.f32.xlu0 %v544_v5  ;;  %v584_v42 = vadd.s32 %v1699_v17, %v1512_v53 }
 0x131   : > { %vm600_vm2 = vcmp.lt.s32.totalorder %v584_v42, 256 }
 0x133   : > { %566 = vadd.xlane.f32.xlu1 %v541_v30  ;;  %576 = vadd.xlane.f32.xlu0 %v546_v9  ;;  %v585_v30 = vadd.s32 %v1699_v17, %v1521_v57 }
 0x135   : > { %vm601_vm4 = vcmp.lt.s32.totalorder %v585_v30, 256 }
 0x137   : > { %570 = vadd.xlane.f32.xlu1 %v543_v54 }
 0x13b   : > { %574 = vadd.xlane.f32.xlu1 %v545_v12 }
 0x13f   : > { %578 = vadd.xlane.f32.xlu1 %v547_v14 }
 0x18c   : > { %v387_v38 = vpop.xlane.xlu0 %386 }
 0x18d   : > { %966 = vlog2.f32 %v387_v38 }
 0x190   : > { %v390_v19 = vpop.xlane.xlu1 %389  ;;  %v393_v20 = vpop.xlane.xlu0 %392 }
 0x191   : > { %968 = vlog2.f32 %v390_v19 }
 0x192   : > { %970 = vlog2.f32 %v393_v20  ;;  %v586_v20 = vadd.s32 %v1699_v17, %v1623_v36  ;;  %v587_v36 = vadd.s32 %v1699_v17, %v1629_v51  ;;  %v588_v51 = vadd.s32 %v1699_v17, %v1635_v15 }
 0x194   : > { %v396_v21 = vpop.xlane.xlu1 %395  ;;  %v399_v39 = vpop.xlane.xlu0 %398  ;;  %vm602_vm5 = vcmp.lt.s32.totalorder %v586_v20, 256  ;;  %vm603_vm6 = vcmp.lt.s32.totalorder %v587_v36, 256  ;;  %vm604_vm7 = vcmp.lt.s32.totalorder %v588_v51, 256 }
 0x195   : > { %972 = vlog2.f32 %v396_v21 }
 0x196   : > { %974 = vlog2.f32 %v399_v39 }
 0x198   : > { %v402_v49 = vpop.xlane.xlu1 %401  ;;  %v405_v40 = vpop.xlane.xlu0 %404 }
 0x199   : > { %976 = vlog2.f32 %v402_v49 }
 0x19a   : > { %v967_v22 = vpop.eup %966  ;;  %978 = vlog2.f32 %v405_v40 }
 0x19b   : > { %v434_v23 = vmul.f32 0.6931472, %v967_v22 }
 0x19c   : > { %v408_v0 = vpop.xlane.xlu1 %407  ;;  %v411_v2 = vpop.xlane.xlu0 %410 }
 0x19d   : > { %v465_v4 = vadd.f32 %v434_v23, %v1526_v62  ;;  %980 = vlog2.f32 %v411_v2 }
 0x19e   : > { %v969_v45 = vpop.eup %968  ;;  %982 = vlog2.f32 %v408_v0 }
 0x19f   : > { %v971_v5 = vpop.eup %970  ;;  %v614_v46 = vsub.f32 %v465_v4, %v549_v61  ;;  %v436_v8 = vmul.f32 0.6931472, %v969_v45 }
 0x1a0   : > { %v438_v9 = vmul.f32 0.6931472, %v971_v5  ;;  %v414_v41 = vpop.xlane.xlu1 %413  ;;  %v417_v47 = vpop.xlane.xlu0 %416 }
 0x1a1   : > { %v466_v54 = vadd.f32 %v436_v8, %v1538_v28  ;;  %v630_v32 = vsel %vm598_vm0, %v614_v46, 0.0  ;;  %984 = vlog2.f32 %v417_v47 }
 0x1a2   : > { %v973_v62 = vpop.eup %972  ;;  %v467_v48 = vadd.f32 %v438_v9, %v1532_v7  ;;  %v647_v7 = vsel %vm646_vm3, %v630_v32, 0.0  ;;  %986 = vlog2.f32 %v414_v41 }
 0x1a3   : > { %v975_v53 = vpop.eup %974  ;;  %v615_v12 = vsub.f32 %v466_v54, %v551_v59  ;;  %v440_v13 = vmul.f32 0.6931472, %v973_v62 }
 0x1a4   : > { %v616_v57 = vsub.f32 %v467_v48, %v553_v60  ;;  %v442_v14 = vmul.f32 0.6931472, %v975_v53  ;;  %v420_v61 = vpop.xlane.xlu1 %419  ;;  %v557_v38 = vpop.xlane.xlu0 %556 }
 0x1a5   : > { %v631_v19 = vsel %vm599_vm1, %v615_v12, 0.0  ;;  %v468_v28 = vadd.f32 %v440_v13, %v1544_v29 }
 0x1a6   : > { %v977_v21 = vpop.eup %976  ;;  %v648_v39 = vsel %vm646_vm3, %v631_v19, 0.0  ;;  %v632_v59 = vsel %vm600_vm2, %v616_v57, 0.0  ;;  %v469_v49 = vadd.f32 %v442_v14, %v1550_v43  ;;  %v589_v19 = vadd.s32 %v1699_v17, %v1653_v44 }
 0x1a7   : > { %v979_v60 = vpop.eup %978  ;;  %v617_v40 = vsub.f32 %v468_v28, %v1694_v37  ;;  %v444_v22 = vmul.f32 0.6931472, %v977_v21  ;;  %v649_v23 = vadd.f32 %v648_v39, %v647_v7  ;;  %v650_v29 = vsel %vm646_vm3, %v632_v59, 0.0 }
 0x1a8   : > { %v423_v24 = vpop.xlane.xlu1 %422  ;;  %v559_v0 = vpop.xlane.xlu0 %558  ;;  %v446_v43 = vmul.f32 0.6931472, %v979_v60  ;;  %v618_v26 = vsub.f32 %v469_v49, %v557_v38  ;;  %vm605_vm9 = vcmp.lt.s32.totalorder %v589_v19, 256  ;;  %v597_v19 = vadd.s32 %v1699_v17, %v1689_v33 }
 0x1a9   : > { %v633_v2 = vsel %vm601_vm4, %v617_v40, 0.0  ;;  %v651_v4 = vadd.f32 %v650_v29, %v649_v23  ;;  %988 = vlog2.f32 %v423_v24  ;;  %v470_v45 = vadd.f32 %v444_v22, %v1556_v50 }
 0x1aa   : > { %990 = vlog2.f32 %v420_v61  ;;  %v652_v37 = vsel %vm646_vm3, %v633_v2, 0.0  ;;  %v981_v30 = vpop.eup %980  ;;  %v634_v9 = vsel %vm602_vm5, %v618_v26, 0.0  ;;  %v471_v41 = vadd.f32 %v446_v43, %v1562_v56 }
 0x1ab   : > { %v653_v42 = vadd.f32 %v652_v37, %v651_v4  ;;  %v619_v5 = vsub.f32 %v470_v45, %v559_v0  ;;  %v983_v50 = vpop.eup %982  ;;  %v450_v48 = vmul.f32 0.6931472, %v981_v30  ;;  %v654_v53 = vsel %vm646_vm3, %v634_v9, 0.0 }
 0x1ac   : > { %v426_v46 = vpop.xlane.xlu1 %425  ;;  %v561_v8 = vpop.xlane.xlu0 %560  ;;  %v448_v13 = vmul.f32 0.6931472, %v983_v50  ;;  %v590_v56 = vadd.s32 %v1699_v17, %v1641_v18  ;;  %v592_v18 = vadd.s32 %v1699_v17, %v1647_v11  ;;  %vm613_vm0 = vcmp.lt.s32.totalorder %v597_v19, 256 }
 0x1ad   : > { %992 = vlog2.f32 %v426_v46  ;;  %v635_v47 = vsel %vm603_vm6, %v619_v5, 0.0  ;;  %v620_v54 = vsub.f32 %v471_v41, %v561_v8  ;;  %v655_v57 = vadd.f32 %v654_v53, %v653_v42 }
 0x1ae   : > { %v985_v12 = vpop.eup %984  ;;  %v656_v15 = vsel %vm646_vm3, %v635_v47, 0.0  ;;  %v473_v20 = vadd.f32 %v450_v48, %v1574_v3  ;;  %v472_v39 = vadd.f32 %v448_v13, %v1568_v58  ;;  %vm606_vm8 = vcmp.lt.s32.totalorder %v590_v56, 256 }
 0x1af   : > { %v987_v14 = vpop.eup %986  ;;  %v636_v61 = vsel %vm604_vm7, %v620_v54, 0.0  ;;  %v454_v28 = vmul.f32 0.6931472, %v985_v12  ;;  %v657_v7 = vadd.f32 %v656_v15, %v655_v57  ;;  %v591_v3 = vadd.s32 %v1699_v17, %v1665_v34 }
 0x1b0   : > { %v429_v62 = vpop.xlane.xlu1 %428  ;;  %v565_v32 = vpop.xlane.xlu0 %564  ;;  %v452_v49 = vmul.f32 0.6931472, %v987_v14  ;;  %v658_v40 = vsel %vm646_vm3, %v636_v61, 0.0  ;;  %v594_v58 = vadd.s32 %v1699_v17, %v1656_v25  ;;  %vm608_vm10 = vcmp.lt.s32.totalorder %v592_v18, 256 }
 0x1b1   : > { %994 = vlog2.f32 %v429_v62  ;;  %v622_v22 = vsub.f32 %v473_v20, %v565_v32  ;;  %v475_v29 = vadd.f32 %v454_v28, %v1586_v1  ;;  %v659_v0 = vadd.f32 %v658_v40, %v657_v7 }
 0x1b2   : > { %v474_v26 = vadd.f32 %v452_v49, %v1580_v10  ;;  %vm607_vm11 = vcmp.lt.s32.totalorder %v591_v3, 256  ;;  %v593_v42 = vadd.s32 %v1699_v17, %v1674_v6  ;;  %vm610_vm12 = vcmp.lt.s32.totalorder %v594_v58, 256 }
 0x1b3   : > { %v638_v45 = vsel %vm606_vm8, %v622_v22, 0.0  ;;  %v596_v6 = vadd.s32 %v1699_v17, %v1668_v35  ;;  %v595_v48 = vadd.s32 %v1699_v17, %v1683_v31 }
 0x1b4   : > { %v432_v38 = vpop.xlane.xlu1 %431  ;;  %v569_v23 = vpop.xlane.xlu0 %568  ;;  %v662_v8 = vsel %vm646_vm3, %v638_v45, 0.0  ;;  %vm609_vm13 = vcmp.lt.s32.totalorder %v593_v42, 256 }
 0x1b5   : > { %996 = vlog2.f32 %v432_v38  ;;  %v624_v43 = vsub.f32 %v475_v29, %v569_v23  ;;  %vm612_vm14 = vcmp.lt.s32.totalorder %v596_v6, 256  ;;  %vm611_vm15 = vcmp.lt.s32.totalorder %v595_v48, 256 }
 0x1b6   : > { %v989_v21 = vpop.eup %988 }
 0x1b7   : > { %v991_v59 = vpop.eup %990  ;;  %v458_v60 = vmul.f32 0.6931472, %v989_v21  ;;  %v640_v10 = vsel %vm608_vm10, %v624_v43, 0.0 }
 0x1b8   : > { %v563_v44 = vpop.xlane.xlu1 %562  ;;  %v456_v36 = vmul.f32 0.6931472, %v991_v59  ;;  %v573_v11 = vpop.xlane.xlu0 %572  ;;  %v666_v13 = vsel %vm646_vm3, %v640_v10, 0.0 }
 0x1b9   : > { %v621_v24 = vsub.f32 %v472_v39, %v563_v44  ;;  %v477_v2 = vadd.f32 %v458_v60, %v1598_v52 }
 0x1ba   : > { %v993_v4 = vpop.eup %992  ;;  %v476_v30 = vadd.f32 %v456_v36, %v1592_v27 }
 0x1bb   : > { %v637_v37 = vsel %vm605_vm9, %v621_v24, 0.0  ;;  %v460_v52 = vmul.f32 0.6931472, %v993_v4  ;;  %v626_v51 = vsub.f32 %v477_v2, %v573_v11 }
 0x1bc   : > { %v660_v34 = vsel %vm646_vm3, %v637_v37, 0.0  ;;  %v567_v1 = vpop.xlane.xlu1 %566  ;;  %v577_v62 = vpop.xlane.xlu0 %576 }
 0x1bd   : > { %v661_v25 = vadd.f32 %v660_v34, %v659_v0  ;;  %v623_v5 = vsub.f32 %v474_v26, %v567_v1  ;;  %v642_v57 = vsel %vm610_vm12, %v626_v51, 0.0  ;;  %v478_v15 = vadd.f32 %v460_v52, %v1604_v55 }
 0x1be   : > { %v995_v46 = vpop.eup %994  ;;  %v670_v20 = vsel %vm646_vm3, %v642_v57, 0.0 }
 0x1bf   : > { %v462_v9 = vmul.f32 0.6931472, %v995_v46  ;;  %v639_v41 = vsel %vm607_vm11, %v623_v5, 0.0  ;;  %v663_v50 = vadd.f32 %v662_v8, %v661_v25 }
 0x1c0   : > { %v664_v47 = vsel %vm646_vm3, %v639_v41, 0.0  ;;  %v571_v54 = vpop.xlane.xlu1 %570 }
 0x1c1   : > { %v665_v53 = vadd.f32 %v664_v47, %v663_v50  ;;  %v625_v32 = vsub.f32 %v476_v30, %v571_v54  ;;  %v479_v12 = vadd.f32 %v462_v9, %v1610_v63 }
 0x1c2   : > { %v997_v27 = vpop.eup %996 }
 0x1c3   : > { %v464_v14 = vmul.f32 0.6931472, %v997_v27  ;;  %v641_v61 = vsel %vm609_vm13, %v625_v32, 0.0  ;;  %v667_v56 = vadd.f32 %v666_v13, %v665_v53  ;;  %v628_v38 = vsub.f32 %v479_v12, %v577_v62 }
 0x1c4   : > { %v668_v35 = vsel %vm646_vm3, %v641_v61, 0.0  ;;  %v575_v31 = vpop.xlane.xlu1 %574 }
 0x1c5   : > { %v669_v63 = vadd.f32 %v668_v35, %v667_v56  ;;  %v627_v28 = vsub.f32 %v478_v15, %v575_v31  ;;  %v644_v21 = vsel %vm612_vm14, %v628_v38, 0.0  ;;  %v480_v55 = vadd.f32 %v464_v14, %v1616_v16 }
 0x1c6   : > { %v674_v22 = vsel %vm646_vm3, %v644_v21, 0.0 }
 0x1c7   : > { %v643_v7 = vsel %vm611_vm15, %v627_v28, 0.0  ;;  %v671_v39 = vadd.f32 %v670_v20, %v669_v63 }
 0x1c8   : > { %v672_v59 = vsel %vm646_vm3, %v643_v7, 0.0  ;;  %v579_v49 = vpop.xlane.xlu1 %578 }
 0x1c9   : > { %v673_v60 = vadd.f32 %v672_v59, %v671_v39  ;;  %v629_v40 = vsub.f32 %v480_v55, %v579_v49 }
 0x1cb   : > { %v645_v23 = vsel %vm613_vm0, %v629_v40, 0.0  ;;  %v675_v33 = vadd.f32 %v674_v22, %v673_v60 }
 0x1cc   : > { %v676_v17 = vsel %vm646_vm3, %v645_v23, 0.0 }
 0x1cd   : > { %v677_v18 = vadd.f32 %v676_v17, %v675_v33 }
 0x1cf   : > { %678 = vadd.xlane.f32.xlu0 %v677_v18 }
 0x258   : > { %v679_v44 = vpop.xlane.xlu0 %678 }
 0x259   : > { %v680_v3 = vrot.slane %v679_v44, 4 }
 0x25b   : > { %v681_v16 = vadd.f32 %v680_v3, %v679_v44 }
 0x25d   : > { %v682_v29 = vrot.slane %v681_v16, 2 }
 0x25f   : > { %v683_v24 = vadd.f32 %v682_v29, %v681_v16 }
 0x261   : > { %v684_v58 = vrot.slane %v683_v24, 1 }
 0x263   : > { %v685_v36 = vadd.f32 %v684_v58, %v683_v24 }
 0x265   : > { %821 = vpush %v685_v36 }
 0x296   : > { %s822_s7 = spop %821 }
 0x297   : > { %v687_v0 = vstv %s822_s7 }
 0x298   : > { %688 = vst [vmem:[%s206_s22] sm:$0xff] %v687_v0 }
 0x299   : > { %1067 = shalt.err (!%p1064_p3)
}
 0x29a   : > { %s1068_s16 = scalar_lea.hbm %s701_s17, 128  ;;  %s1072_s9 = scalar_lea.hbm %s1823_s2, 256 }
 0x29b   : > { %p1069_p0 = scmp.ne.s32.totalorder %s701_s17, %s1068_s16  ;;  %p1073_p7 = scmp.lt.s32.totalorder %s701_s17, %s1823_s2 }
 0x29c   : > { %p1074_p6 = scmp.lt.s32.totalorder %s1072_s9, %s1068_s16 }
 0x29d   : > { %p1070_p1 = pnand %p1069_p0, %p1848_p4 }
 0x29e   : > { %p1075_p9 = por %p1074_p6, %p1073_p7 }
 0x29f   : > { %p1071_p2 = pneg %p1070_p1 }
 0x2a1   : > { %p1076_p5 = pnand %p1075_p9, %p1071_p2 }
 0x2a3   : > { %1079 = shalt.err (!%p1076_p5)
}
 0x2a4   : > { %827 = dma.vmem_to_hbm [thread:$0]  (%p1848_p4), %s1770_s25, 128, %s701_s17, %s690_s19  }
 0x2a5 PF: > { %s715_s22 = sand.u32 1, %s1134_s12   ;;  %p1849_p8 = scmp.ne.s32.totalorder %s1835_s27, 0 }
 0x2a6   : > { %p1850_p10 = scmp.ge.s32.totalorder %s1146_s15, 2  ;;  %s716_s7 = scalar_lea.sflag [#allocation4], %s715_s22 }
 0x2a8   : > { %p837_p11 = pnand %p1850_p10, %p1849_p8 }
 0x2aa   : > { %p838_p12 = pneg %p837_p11 }
 0x2ac   : > { %1117 = dma.done.wait (%p838_p12), %s716_s7, 128  }
 0x2ad   : > { %1119 = vsyncadd (%p838_p12), %s716_s7, 4294967168  ;;  %p18_p4 = scmp.ge.s32.totalorder %s1210_s18, 4   ;;  %s1851_s9 = smov %s1126_s10 }
 0x2ae   : > { %s1852_s10 = smov %s1130_s11  ;;  %s1853_s11 = smov %s1301_s29 }
 0x2af   : > { %s1854_s12 = smov %s1138_s13  ;;  %s1855_s13 = smov %s1142_s14 }
 0x2b0   : > { %s1856_s14 = smov %s1222_s21  ;;  %s1857_s15 = smov %s1210_s18 }
 0x2b1   :  { %20 = sbr.rel (!%p18_p4) target bundleno = 9 (0x9), region = 86 }
 0x2b6   :  { %721 = vsyncpa [#allocation3], 1 }
 0x2b7   :  { %723 = vsyncpa [#allocation3 + $0x1], 1 }
 0x2b8   :  { %724 = vsyncpa [#allocation6], 1 }
 0x2b9   :  { %726 = vsyncpa [#allocation6 + $0x1], 1 }
 0x2ba   :  { %727 = vsyncpa [#allocation4], 1 }
 0x2bb   :  { %729 = vsyncpa [#allocation4 + $0x1], 1 }

</bundles_post_ra>
